<compile_context>
chip_gen: v5e
topology: v5e:2x2
jax: 0.10.0
libtpu: 0.0.40
codegen_flags: <defaults>
</compile_context>

<pallas_src>
import functools

import numpy as np
import jax
import jax.numpy as jnp
from jax.experimental import pallas as pl
from jax.experimental.pallas import tpu as pltpu


def _round_up(x, m):
    return (x + m - 1) // m * m


def _wmse_partial_kernel(t1_ref, t2_ref, m_ref, out_ref, acc_ref, *, n_lane_chunks):
    """Accumulate sum_D (t1-t2)^2 per row into acc (Bt,128); at the last D tile
    apply the row mask and emit this batch tile's partial sum (lane-dense)."""
    j = pl.program_id(1)

    @pl.when(j == 0)
    def _():
        acc_ref[...] = jnp.zeros_like(acc_ref)

    # native-dtype load, f32 math
    diff = t1_ref[...].astype(jnp.float32) - t2_ref[...].astype(jnp.float32)
    sq = diff * diff                                      # (Bt, Dt) f32

    # Fold the lane axis down to 128 lanes with plain VPU adds (aligned static
    # 128-lane slices; no per-tile cross-lane XLU reduce).
    part = sq[:, 0:128]
    for c in range(1, n_lane_chunks):
        part = part + sq[:, c * 128:(c + 1) * 128]
    acc_ref[...] += part                                  # (Bt, 128)

    @pl.when(j == pl.num_programs(1) - 1)
    def _():
        # one cross-lane reduce per batch tile, then mask rows and reduce rows
        row = jnp.sum(acc_ref[...], axis=1, keepdims=True)    # (Bt, 1)
        partial = jnp.sum(row * m_ref[...])                   # scalar
        # lane-dense (1, 8, 128) output block; wrapper reads element [0, 0]
        out_ref[...] = jnp.full(out_ref.shape, partial, dtype=jnp.float32)


def wmse_loss(t1, t2, w, *, block_b=256, block_d=2048):
    """Weighted MSE loss. t1, t2: (B, ...); w: (B,) with {0,1}-style weights.

    Default tiles (256 x 2048) keep the double-buffered footprint ~8 MiB
    (f32) so they fit v7x's 32 MiB scoped VMEM default; v5e/v6e can pass
    larger block_d if desired.
    """
    B = t1.shape[0]
    D = int(np.prod(t1.shape[1:])) if t1.ndim > 1 else 1

    # keep native dtype: no full-array f32 cast pass, half the HBM bytes for bf16
    t1f = jnp.reshape(t1, (B, D))
    t2f = jnp.reshape(t2, (B, D))

    wv = jnp.reshape(w, (B,))
    mask = (wv == 1).astype(jnp.float32)                 # tiny (B,) row mask
    wsum = jnp.sum(wv.astype(jnp.float32))
    cnt = jnp.sum(mask)

    # tile sizes: sublane multiple of 8, lane multiple of 128
    Bt = min(_round_up(block_b, 8), _round_up(B, 8))
    Dt = min(_round_up(block_d, 128), _round_up(D, 128))
    Bp = _round_up(B, Bt)
    Dp = _round_up(D, Dt)
    if (Bp, Dp) != (B, D):
        # zero padding contributes 0 to the squared-error sum
        t1f = jnp.pad(t1f, ((0, Bp - B), (0, Dp - D)))
        t2f = jnp.pad(t2f, ((0, Bp - B), (0, Dp - D)))
    mask2d = jnp.pad(mask, (0, Bp - B)).reshape(Bp, 1)

    nb, nd = Bp // Bt, Dp // Dt

    kernel = functools.partial(_wmse_partial_kernel, n_lane_chunks=Dt // 128)

    itemsize = jnp.dtype(t1f.dtype).itemsize
    cost = pl.CostEstimate(
        flops=3 * Bp * Dp,
        transcendentals=0,
        bytes_accessed=2 * Bp * Dp * itemsize + Bp * 4 + nb * 8 * 128 * 4,
    )

    partials = pl.pallas_call(
        kernel,
        out_shape=jax.ShapeDtypeStruct((nb, 8, 128), jnp.float32),
        grid_spec=pltpu.PrefetchScalarGridSpec(
            num_scalar_prefetch=0,
            grid=(nb, nd),
            in_specs=[
                pl.BlockSpec((Bt, Dt), lambda i, j: (i, j)),
                pl.BlockSpec((Bt, Dt), lambda i, j: (i, j)),
                # row mask stays resident across the D (reduction) axis
                pl.BlockSpec((Bt, 1), lambda i, j: (i, 0)),
            ],
            out_specs=pl.BlockSpec((1, 8, 128), lambda i, j: (i, 0, 0)),
            scratch_shapes=[pltpu.VMEM((Bt, 128), jnp.float32)],
        ),
        compiler_params=pltpu.CompilerParams(
            # batch-tile axis can split across TensorCores (v7x); the reduction
            # axis feeds the accumulator and must be arbitrary.
            dimension_semantics=("parallel", "arbitrary"),
        ),
        cost_estimate=cost,
    )(t1f, t2f, mask2d)

    total = jnp.sum(partials[:, 0, 0])
    denom = cnt * jnp.float32(D)
    # w.sum()==0 -> 0.0 ; w.sum()!=0 but no exact w==1 -> NaN (matches torch's
    # MSELoss over an empty selection).
    return jnp.where(wsum == 0.0, jnp.float32(0.0), total / denom)


def _ref(t1, t2, w):
    """Plain-JAX reference with identical semantics."""
    B = t1.shape[0]
    d = (t1.astype(jnp.float32) - t2.astype(jnp.float32)).reshape(B, -1)
    mask = (w == 1).astype(jnp.float32)
    cnt = jnp.sum(mask)
    return jnp.where(
        jnp.sum(w.astype(jnp.float32)) == 0.0,
        jnp.float32(0.0),
        jnp.sum(d * d * mask[:, None]) / (cnt * d.shape[1]),
    )


if __name__ == "__main__":
    key = jax.random.PRNGKey(0)
    k1, k2, k3, k4, k5 = jax.random.split(key, 5)

    # --- test 1: f32, (8, 4, 16, 16), single tile ---------------------------
    B, C, H, W = 8, 4, 16, 16
    t1 = jax.random.normal(k1, (B, C, H, W), dtype=jnp.float32)
    t2 = jax.random.normal(k2, (B, C, H, W), dtype=jnp.float32)
    w = (jax.random.uniform(k3, (B,)) > 0.5).astype(jnp.float32)

    out = wmse_loss(t1, t2, w)
    jax.block_until_ready(out)
    np.testing.assert_allclose(
        np.asarray(out), np.asarray(_ref(t1, t2, w)), rtol=1e-5, atol=1e-6
    )

    # all-zero-weights branch
    out0 = wmse_loss(t1, t2, jnp.zeros((B,), jnp.float32))
    jax.block_until_ready(out0)
    np.testing.assert_allclose(np.asarray(out0), 0.0, atol=1e-7)

    # --- test 2: bf16 inputs, non-aligned D, multi-tile grid ----------------
    B2, C2, H2, W2 = 16, 4, 10, 10          # D = 400 -> padded to 512
    t1b = jax.random.normal(k4, (B2, C2, H2, W2), dtype=jnp.bfloat16)
    t2b = jax.random.normal(k5, (B2, C2, H2, W2), dtype=jnp.bfloat16)
    wb = (jnp.arange(B2) % 3 == 0).astype(jnp.float32)

    outb = wmse_loss(t1b, t2b, wb, block_b=8, block_d=256)   # grid = (2, 2)
    jax.block_until_ready(outb)
    np.testing.assert_allclose(
        np.asarray(outb), np.asarray(_ref(t1b, t2b, wb)), rtol=1e-5, atol=1e-6
    )

    print("KERNEL_OK")
</pallas_src>

<mosaic_0001>
module attributes {stable_mosaic.version = 11 : i64} {
  func.func @_wmse_partial_kernel(%arg0: i32, %arg1: i32, %arg2: memref<8x1024xf32, #tpu.memory_space<vmem>>, %arg3: memref<8x1024xf32, #tpu.memory_space<vmem>>, %arg4: memref<8x1xf32, #tpu.memory_space<vmem>>, %arg5: memref<1x8x128xf32, #tpu.memory_space<vmem>>, %arg6: memref<8x128xf32, #tpu.memory_space<vmem>>) attributes {dimension_semantics = [#tpu.dimension_semantics<parallel>, #tpu.dimension_semantics<arbitrary>], iteration_bounds = array<i64: 1, 1>, scalar_prefetch = 0 : i64, scratch_operands = 1 : i64, tpu.core_type = #tpu.core_type<tc>, window_params = [{transform_indices = @transform_0, window_bounds = array<i64: 8, 1024>}, {transform_indices = @transform_1, window_bounds = array<i64: 8, 1024>}, {transform_indices = @transform_2, window_bounds = array<i64: 8, 1>}, {transform_indices = @transform_3, window_bounds = array<i64: 1, 8, 128>}]} {
    %c0_i32 = arith.constant 0 : i32
    %0 = arith.cmpi eq, %arg1, %c0_i32 : i32
    %1 = arith.extui %0 : i1 to i32
    %c0_i32_0 = arith.constant 0 : i32
    %2 = arith.cmpi ne, %1, %c0_i32_0 : i32
    scf.if %2 {
      %cst = arith.constant 0.000000e+00 : f32
      %28 = vector.broadcast %cst : f32 to vector<8x128xf32>
      %c0_10 = arith.constant 0 : index
      %c0_11 = arith.constant 0 : index
      %29 = vector.load %arg6[%c0_10, %c0_11] : memref<8x128xf32, #tpu.memory_space<vmem>>, vector<8x128xf32>
      tpu.vector_store %arg6[%c0_10, %c0_11], %28 {strides = array<i32>} : memref<8x128xf32, #tpu.memory_space<vmem>>, vector<8x128xf32>,
    } else {
    }
    %c0 = arith.constant 0 : index
    %c0_1 = arith.constant 0 : index
    %3 = vector.load %arg2[%c0, %c0_1] : memref<8x1024xf32, #tpu.memory_space<vmem>>, vector<8x1024xf32>
    %c0_2 = arith.constant 0 : index
    %c0_3 = arith.constant 0 : index
    %4 = vector.load %arg3[%c0_2, %c0_3] : memref<8x1024xf32, #tpu.memory_space<vmem>>, vector<8x1024xf32>
    %5 = arith.subf %3, %4 : vector<8x1024xf32>
    %6 = arith.mulf %5, %5 : vector<8x1024xf32>
    %7 = vector.extract_strided_slice %6 {offsets = [0, 0], sizes = [8, 128], strides = [1, 1]} : vector<8x1024xf32> to vector<8x128xf32>
    %8 = vector.extract_strided_slice %6 {offsets = [0, 128], sizes = [8, 128], strides = [1, 1]} : vector<8x1024xf32> to vector<8x128xf32>
    %9 = arith.addf %7, %8 : vector<8x128xf32>
    %10 = vector.extract_strided_slice %6 {offsets = [0, 256], sizes = [8, 128], strides = [1, 1]} : vector<8x1024xf32> to vector<8x128xf32>
    %11 = arith.addf %9, %10 : vector<8x128xf32>
    %12 = vector.extract_strided_slice %6 {offsets = [0, 384], sizes = [8, 128], strides = [1, 1]} : vector<8x1024xf32> to vector<8x128xf32>
    %13 = arith.addf %11, %12 : vector<8x128xf32>
    %14 = vector.extract_strided_slice %6 {offsets = [0, 512], sizes = [8, 128], strides = [1, 1]} : vector<8x1024xf32> to vector<8x128xf32>
    %15 = arith.addf %13, %14 : vector<8x128xf32>
    %16 = vector.extract_strided_slice %6 {offsets = [0, 640], sizes = [8, 128], strides = [1, 1]} : vector<8x1024xf32> to vector<8x128xf32>
    %17 = arith.addf %15, %16 : vector<8x128xf32>
    %18 = vector.extract_strided_slice %6 {offsets = [0, 768], sizes = [8, 128], strides = [1, 1]} : vector<8x1024xf32> to vector<8x128xf32>
    %19 = arith.addf %17, %18 : vector<8x128xf32>
    %20 = vector.extract_strided_slice %6 {offsets = [0, 896], sizes = [8, 128], strides = [1, 1]} : vector<8x1024xf32> to vector<8x128xf32>
    %21 = arith.addf %19, %20 : vector<8x128xf32>
    %c0_4 = arith.constant 0 : index
    %c0_5 = arith.constant 0 : index
    %22 = vector.load %arg6[%c0_4, %c0_5] : memref<8x128xf32, #tpu.memory_space<vmem>>, vector<8x128xf32>
    %23 = arith.addf %22, %21 : vector<8x128xf32>
    %c0_6 = arith.constant 0 : index
    %c0_7 = arith.constant 0 : index
    %24 = vector.load %arg6[%c0_6, %c0_7] : memref<8x128xf32, #tpu.memory_space<vmem>>, vector<8x128xf32>
    tpu.vector_store %arg6[%c0_6, %c0_7], %23 {strides = array<i32>} : memref<8x128xf32, #tpu.memory_space<vmem>>, vector<8x128xf32>,
    %c0_i32_8 = arith.constant 0 : i32
    %25 = arith.cmpi eq, %arg1, %c0_i32_8 : i32
    %26 = arith.extui %25 : i1 to i32
    %c0_i32_9 = arith.constant 0 : i32
    %27 = arith.cmpi ne, %26, %c0_i32_9 : i32
    scf.if %27 {
      %c0_10 = arith.constant 0 : index
      %c0_11 = arith.constant 0 : index
      %28 = vector.load %arg6[%c0_10, %c0_11] : memref<8x128xf32, #tpu.memory_space<vmem>>, vector<8x128xf32>
      %cst = arith.constant dense<0.000000e+00> : vector<8xf32>
      %29 = vector.multi_reduction <add>, %28, %cst [1] : vector<8x128xf32> to vector<8xf32>
      %30 = vector.shape_cast %29 : vector<8xf32> to vector<8x1xf32>
      %c0_12 = arith.constant 0 : index
      %c0_13 = arith.constant 0 : index
      %31 = vector.load %arg4[%c0_12, %c0_13] : memref<8x1xf32, #tpu.memory_space<vmem>>, vector<8x1xf32>
      %32 = arith.mulf %30, %31 : vector<8x1xf32>
      %33 = vector.shape_cast %32 : vector<8x1xf32> to vector<1x8x1xf32>
      %cst_14 = arith.constant dense<0.000000e+00> : vector<1xf32>
      %34 = vector.multi_reduction <add>, %33, %cst_14 [1, 2] : vector<1x8x1xf32> to vector<1xf32>
      %35 = vector.shape_cast %34 : vector<1xf32> to vector<1x1x1xf32>
      %36 = vector.extract %35[0, 0, 0] : f32 from vector<1x1x1xf32>
      %37 = vector.broadcast %36 : f32 to vector<1x8x128xf32>
      %c0_15 = arith.constant 0 : index
      %c0_16 = arith.constant 0 : index
      %c0_17 = arith.constant 0 : index
      %38 = vector.load %arg5[%c0_15, %c0_16, %c0_17] : memref<1x8x128xf32, #tpu.memory_space<vmem>>, vector<1x8x128xf32>
      tpu.vector_store %arg5[%c0_15, %c0_16, %c0_17], %37 {strides = array<i32>} : memref<1x8x128xf32, #tpu.memory_space<vmem>>, vector<1x8x128xf32>,
    } else {
    }
    return
  }
  func.func @transform_0(%arg0: i32, %arg1: i32) -> (i32, i32) {
    %c0_i32 = arith.constant 0 : i32
    return %arg0, %arg1 : i32, i32
  }
  func.func @transform_1(%arg0: i32, %arg1: i32) -> (i32, i32) {
    %c0_i32 = arith.constant 0 : i32
    return %arg0, %arg1 : i32, i32
  }
  func.func @transform_2(%arg0: i32, %arg1: i32) -> (i32, i32) {
    %c0_i32 = arith.constant 0 : i32
    %c0_i32_0 = arith.constant 0 : i32
    return %arg0, %c0_i32 : i32, i32
  }
  func.func @transform_3(%arg0: i32, %arg1: i32) -> (i32, i32, i32) {
    %c0_i32 = arith.constant 0 : i32
    %c0_i32_0 = arith.constant 0 : i32
    %c0_i32_1 = arith.constant 0 : i32
    return %arg0, %c0_i32, %c0_i32_0 : i32, i32, i32
  }
}

</mosaic_0001>

<bundles_post_ra>
// kernel: tpu_custom_call.1
= control target key start
LH: loop header
LB: loop body
LE: loop exit
PB: predicated region body
PF: predicated region fallthrough
CT: control target
= control target key end

     0   :  { %8 = vsyncpa [#allocation4], 0  ;;  %s247_s0 = inlined_call_operand.hbm [shape: f32[8,1024], index: 0, kind: input, shape index: {}]   ;;  %s248_s1 = inlined_call_operand.hbm [shape: f32[8,1024], index: 1, kind: input, shape index: {}]   ;;  %s249_s2 = inlined_call_operand.vmem [shape: f32[8,1], index: 2, kind: input, shape index: {}]   ;;  %s250_s3 = inlined_call_operand.hbm [shape: f32[1,8,128], index: 3, kind: output, shape index: {}]  }
   0x1   :  { %9 = vsyncpa [#allocation7], 0 }
   0x2   :  { %10 = vsyncpa [#allocation5], 0  ;;  %s16_s14 = sshll.u32 %s247_s0, 4  ;;  %s212_s15 = smov [#allocation3]   ;;  %s17_s14 = int_to_ptr.hbm [resolvable:$true] %s16_s14 }
   0x3   :  { %s18_s16 = sshll.u32 %s212_s15, 4  ;;  %s27_s19 = sshll.u32 %s248_s1, 4  ;;  %s19_s16 = int_to_ptr.vmem [resolvable:$true] %s18_s16  ;;  %s28_s19 = int_to_ptr.hbm [resolvable:$true] %s27_s19 }
   0x4   :  { %21 = dma.hbm_to_vmem [thread:$0]  %s17_s14, 1024, %s19_s16, [#allocation4]  }
   0x5   :  { %s213_s20 = smov [#allocation6]  }
   0x6   :  { %s29_s21 = sshll.u32 %s213_s20, 4  ;;  %s30_s21 = int_to_ptr.vmem [resolvable:$true] %s29_s21 }
   0x7   :  { %32 = dma.hbm_to_vmem [thread:$0]  %s28_s19, 1024, %s30_s21, [#allocation7]  }
   0x8   :  { %206 = dma.done.wait [#allocation4], 1024  }
   0x9   :  { %207 = vsyncadd [#allocation4], 4294966272 }
   0xa   :  { %208 = dma.done.wait [#allocation7], 1024  }
   0xb   :  { %209 = vsyncadd [#allocation7], 4294966272  ;;  %v48_v0 = vld [vmem:[#allocation3] sm:$0xff]  ;;  %v49_v1 = vld [vmem:[#allocation3 + $0x8] sm:$0xff]  ;;  %vm98_vm0 = vcmask 7168   ;;  %s214_s22 = smov [#allocation8]  }
   0xc   :  { %v50_v2 = vld [vmem:[#allocation3 + $0x10] sm:$0xff]  ;;  %v51_v3 = vld [vmem:[#allocation3 + $0x18] sm:$0xff]  ;;  %v52_v4 = vld [vmem:[#allocation3 + $0x20] sm:$0xff]  ;;  %s116_s23 = sshll.u32 %s214_s22, 4  ;;  %s118_s26 = sshll.u32 %s250_s3, 4  ;;  %s117_s23 = int_to_ptr.vmem [resolvable:$true] %s116_s23  ;;  %s119_s26 = int_to_ptr.hbm [resolvable:$true] %s118_s26 }
   0xd   :  { %v56_v5 = vld [vmem:[#allocation6] sm:$0xff]  ;;  %v57_v6 = vld [vmem:[#allocation6 + $0x8] sm:$0xff]  ;;  %v58_v7 = vld [vmem:[#allocation6 + $0x10] sm:$0xff] }
   0xe   :  { %v59_v8 = vld [vmem:[#allocation6 + $0x18] sm:$0xff]  ;;  %v64_v9 = vsub.f32 %v48_v0, %v56_v5  ;;  %v60_v10 = vld [vmem:[#allocation6 + $0x20] sm:$0xff]  ;;  %v65_v11 = vsub.f32 %v49_v1, %v57_v6  ;;  %v66_v12 = vsub.f32 %v50_v2, %v58_v7  ;;  %v53_v14 = vld [vmem:[#allocation3 + $0x28] sm:$0xff] }
   0xf   :  { %v67_v13 = vsub.f32 %v51_v3, %v59_v8  ;;  %v61_v15 = vld [vmem:[#allocation6 + $0x28] sm:$0xff]  ;;  %v68_v17 = vsub.f32 %v52_v4, %v60_v10  ;;  %v54_v20 = vld [vmem:[#allocation3 + $0x30] sm:$0xff]  ;;  %v55_v25 = vld [vmem:[#allocation3 + $0x38] sm:$0xff] }
  0x10   :  { %v72_v16 = vmul.f32 %v64_v9, %v64_v9  ;;  %v73_v18 = vmul.f32 %v65_v11, %v65_v11  ;;  %v74_v19 = vmul.f32 %v66_v12, %v66_v12  ;;  %v62_v21 = vld [vmem:[#allocation6 + $0x30] sm:$0xff]  ;;  %v69_v22 = vsub.f32 %v53_v14, %v61_v15  ;;  %v63_v26 = vld [vmem:[#allocation6 + $0x38] sm:$0xff]  ;;  %v96_v39 = vld [vmem:[%s249_s2] sm:$0xff] }
  0x11   :  { %v75_v23 = vmul.f32 %v67_v13, %v67_v13  ;;  %v70_v27 = vsub.f32 %v54_v20, %v62_v21  ;;  %v76_v28 = vmul.f32 %v68_v17, %v68_v17  ;;  %v71_v30 = vsub.f32 %v55_v25, %v63_v26 }
  0x12   :  { %v80_v24 = vadd.f32 %v73_v18, %v72_v16  ;;  %v77_v31 = vmul.f32 %v69_v22, %v69_v22 }
  0x13   :  { %v78_v33 = vmul.f32 %v70_v27, %v70_v27  ;;  %v79_v35 = vmul.f32 %v71_v30, %v71_v30 }
  0x14   :  { %v81_v29 = vadd.f32 %v80_v24, %v74_v19 }
  0x16   :  { %v82_v32 = vadd.f32 %v81_v29, %v75_v23 }
  0x18   :  { %v83_v34 = vadd.f32 %v82_v32, %v76_v28 }
  0x1a   :  { %v84_v36 = vadd.f32 %v83_v34, %v77_v31 }
  0x1c   :  { %v85_v37 = vadd.f32 %v84_v36, %v78_v33 }
  0x1e   :  { %v86_v38 = vadd.f32 %v85_v37, %v79_v35 }
  0x20   :  { %94 = vadd.xlane.f32.xlu0 %v86_v38 }
  0x93   :  { %v95_v40 = vpop.xlane.xlu0 %94 }
  0x94   :  { %v97_v41 = vmul.f32 %v96_v39, %v95_v40 }
  0x96   :  { %v99_v42 = vsel %vm98_vm0, %v97_v41, 0.0 }
  0x97   :  { %100 = vadd.xlane.f32.xlu0 %v99_v42 }
 0x10a   :  { %v101_v43 = vpop.xlane.xlu0 %100 }
 0x10b   :  { %v102_v44 = vrot.slane %v101_v43, 4 }
 0x10d   :  { %v103_v45 = vadd.f32 %v102_v44, %v101_v43 }
 0x10f   :  { %v104_v46 = vrot.slane %v103_v45, 2 }
 0x111   :  { %v105_v47 = vadd.f32 %v104_v46, %v103_v45 }
 0x113   :  { %v106_v48 = vrot.slane %v105_v47, 1 }
 0x115   :  { %v107_v49 = vadd.f32 %v106_v48, %v105_v47 }
 0x117   :  { %129 = vpush %v107_v49 }
 0x148   :  { %s130_s2 = spop %129 }
 0x149   :  { %v109_v50 = vstv %s130_s2 }
 0x14a   :  { %110 = vst [vmem:[#allocation8] sm:$0xff] %v109_v50 }
 0x14b   :  { %121 = dma.vmem_to_hbm [thread:$0]  %s117_s23, 128, %s119_s26, [#allocation5]  }
 0x14c   :  { %210 = dma.done.wait [#allocation5], 128  }
 0x14d   :  { %211 = vsyncadd [#allocation5], 4294967168 }
 0x14e   :  { %126 = vsyncpa [#allocation4], 1 }
 0x14f   :  { %127 = vsyncpa [#allocation7], 1 }
 0x150   :  { %128 = vsyncpa [#allocation5], 1 }

</bundles_post_ra>
